<compile_context>
chip_gen: v7x
topology: tpu7x:2x2x1
jax: 0.10.0
libtpu: 0.0.40
codegen_flags: <defaults>
</compile_context>

<pallas_src>
import jax
import jax.numpy as jnp
from jax.experimental import pallas as pl
from jax.experimental.pallas import tpu as pltpu

NEG_SLOPE = 0.3          # nn.LeakyReLU(0.3)
_LANE = 128              # TPU lane width
_SUBLANE = 8             # TPU sublane width
_TILE_CAP = 512          # max batch-tile rows (mem-bound sweet spot)
_VMEM_BUDGET = 32 << 20  # conservative budget: fits v5e/v6e/v7x scoped limits


def _round_up(x, m):
    return -(-x // m) * m


def net_fc_kernel(x_ref, wt_ref, b_ref, o_ref):
    """One batch tile: fused matmul + bias + LeakyReLU.

    x_ref : (TM, Kp)  bf16 activation tile
    wt_ref: (Kp, Cp)  bf16 pre-transposed weight (resident across the grid)
    b_ref : (1,  Cp)  f32 bias row
    o_ref : (TM, Cp)  output tile
    """
    y = jnp.dot(x_ref[...], wt_ref[...], preferred_element_type=jnp.float32)
    y = y + b_ref[...]
    o_ref[...] = jnp.maximum(y, NEG_SLOPE * y).astype(o_ref.dtype)


def net_fc_forward(x, weight, bias, *, compute_dtype=jnp.bfloat16):
    """x: (N, input_size); weight: (num_classes, input_size); bias: (num_classes,)."""
    N, K = x.shape
    C, K_w = weight.shape
    assert K_w == K, f"weight in_features {K_w} != input feature dim {K}"
    assert bias.shape == (C,), f"bias shape {bias.shape} != ({C},)"

    out_dtype = x.dtype
    in_bytes = jnp.dtype(compute_dtype).itemsize
    out_bytes = jnp.dtype(out_dtype).itemsize

    # ---- lane/sublane-friendly padded shapes --------------------------------
    K_pad = _round_up(K, _LANE)
    C_pad = _round_up(C, _LANE)
    N_pad8 = _round_up(N, _SUBLANE)

    # ---- VMEM budget -> batch tile ------------------------------------------
    weight_bytes = K_pad * C_pad * in_bytes
    bias_bytes = _SUBLANE * C_pad * 4                       # (1,Cp) pads to 8 sublanes
    per_row = 2 * K_pad * in_bytes + 2 * C_pad * out_bytes  # double-buffered x/out tiles
    avail = _VMEM_BUDGET - 2 * weight_bytes - 2 * bias_bytes
    if avail < _SUBLANE * per_row:
        # TODO(synk): K-tiled accumulator path for very large weights (see header).
        raise ValueError(
            f"resident weight ({weight_bytes / 2**20:.1f} MiB) exceeds the VMEM "
            "budget of this kernel")
    tile_cap = min(_TILE_CAP, (avail // per_row) // _SUBLANE * _SUBLANE)
    num_tiles = -(-N_pad8 // tile_cap)
    if N_pad8 >= 2 * _SUBLANE:
        num_tiles = max(num_tiles, 2)   # >=2 grid steps: pipelining + v7x megacore
    tile_m = _round_up(-(-N_pad8 // num_tiles), _SUBLANE)
    N_pad = tile_m * num_tiles

    vmem_need = (2 * weight_bytes + 2 * bias_bytes
                 + 2 * tile_m * K_pad * in_bytes
                 + 2 * tile_m * C_pad * out_bytes)
    vmem_limit = min(int(vmem_need * 1.5) + (4 << 20), 64 << 20)

    # ---- one-time layout work in XLA (outside the kernel's critical path) ---
    x_p = jnp.pad(x.astype(compute_dtype), ((0, N_pad - N), (0, K_pad - K)))
    wt_p = jnp.pad(weight.T.astype(compute_dtype),
                   ((0, K_pad - K), (0, C_pad - C)))                  # (Kp, Cp)
    b_p = jnp.pad(bias.astype(jnp.float32), (0, C_pad - C)).reshape(1, C_pad)

    def build(single_buffer_resident):
        res_kw = {}
        if single_buffer_resident:
            # Grid-invariant blocks gain nothing from double-buffering.
            res_kw = dict(pipeline_mode=pl.Buffered(1))
        grid_spec = pltpu.PrefetchScalarGridSpec(
            num_scalar_prefetch=0,
            grid=(N_pad // tile_m,),
            in_specs=[
                pl.BlockSpec((tile_m, K_pad), lambda i: (i, 0)),           # x tile
                pl.BlockSpec((K_pad, C_pad), lambda i: (0, 0), **res_kw),  # weight
                pl.BlockSpec((1, C_pad), lambda i: (0, 0), **res_kw),      # bias
            ],
            out_specs=pl.BlockSpec((tile_m, C_pad), lambda i: (i, 0)),
        )
        return pl.pallas_call(
            net_fc_kernel,
            out_shape=jax.ShapeDtypeStruct((N_pad, C_pad), out_dtype),
            grid_spec=grid_spec,
            compiler_params=pltpu.CompilerParams(
                dimension_semantics=("parallel",),
                vmem_limit_bytes=vmem_limit,
            ),
        )

    try:
        out_p = build(single_buffer_resident=hasattr(pl, "Buffered"))(x_p, wt_p, b_p)
    except Exception:
        # Some Pallas versions may not honor pipeline_mode on top-level
        # pallas_call BlockSpecs; fall back to default (double-buffered) specs.
        out_p = build(single_buffer_resident=False)(x_p, wt_p, b_p)

    return out_p[:N, :C]


def reference(x, weight, bias):
    """Pure-JAX f32 reference of net_fc.forward."""
    y = x @ weight.T + bias[None, :]
    return jnp.where(y >= 0.0, y, NEG_SLOPE * y)


if __name__ == "__main__":
    # Small shapes consistent with a classifier FC head.
    batch, input_size, num_classes = 16, 32, 4

    key = jax.random.PRNGKey(0)
    kx, kw, kb = jax.random.split(key, 3)

    x = jax.random.normal(kx, (batch, input_size), jnp.float32)
    # PyTorch nn.Linear layout: weight (out_features, in_features), bias (out,)
    weight = 0.1 * jax.random.normal(kw, (num_classes, input_size), jnp.float32)
    bias = 0.1 * jax.random.normal(kb, (num_classes,), jnp.float32)

    out = jax.block_until_ready(net_fc_forward(x, weight, bias))

    ref = reference(x, weight, bias)
    assert out.shape == ref.shape == (batch, num_classes)
    # Tolerance loosened deliberately: MXU operands are bf16 (f32 accumulation),
    # compared against the full-f32 reference.
    assert jnp.allclose(out, ref, atol=3e-2, rtol=3e-2), \
        f"max abs diff {jnp.max(jnp.abs(out - ref))}"

    print("KERNEL_OK")
</pallas_src>

<mosaic_0001>
module attributes {stable_mosaic.version = 11 : i64} {
  func.func @net_fc_kernel(%arg0: i32, %arg1: memref<8x128xbf16, #tpu.memory_space<vmem>>, %arg2: memref<128x128xbf16, #tpu.memory_space<vmem>>, %arg3: memref<1x128xf32, #tpu.memory_space<vmem>>, %arg4: memref<8x128xf32, #tpu.memory_space<vmem>>) attributes {dimension_semantics = [#tpu.dimension_semantics<parallel>], iteration_bounds = array<i64: 2>, scalar_prefetch = 0 : i64, scratch_operands = 0 : i64, tpu.core_type = #tpu.core_type<tc>, window_params = [{transform_indices = @transform_0, window_bounds = array<i64: 8, 128>}, {pipeline_mode = #tpu.pipeline_mode<synchronous>, transform_indices = @transform_1, window_bounds = array<i64: 128, 128>}, {pipeline_mode = #tpu.pipeline_mode<synchronous>, transform_indices = @transform_2, window_bounds = array<i64: 1, 128>}, {transform_indices = @transform_3, window_bounds = array<i64: 8, 128>}]} {
    %c0 = arith.constant 0 : index
    %c0_0 = arith.constant 0 : index
    %0 = vector.load %arg1[%c0, %c0_0] : memref<8x128xbf16, #tpu.memory_space<vmem>>, vector<8x128xbf16>
    %c0_1 = arith.constant 0 : index
    %c0_2 = arith.constant 0 : index
    %1 = vector.load %arg2[%c0_1, %c0_2] : memref<128x128xbf16, #tpu.memory_space<vmem>>, vector<128x128xbf16>
    %cst = arith.constant dense<0.000000e+00> : vector<8x128xf32>
    %2 = tpu.matmul %0, %1, %cst {dimension_numbers = #tpu.dot_dimension_numbers<[1], [0], [0], [1], [0, 0, 1, 1], [], []>} : vector<8x128xbf16>, vector<128x128xbf16>, vector<8x128xf32> -> vector<8x128xf32>
    %c0_3 = arith.constant 0 : index
    %c0_4 = arith.constant 0 : index
    %3 = vector.load %arg3[%c0_3, %c0_4] : memref<1x128xf32, #tpu.memory_space<vmem>>, vector<1x128xf32>
    %4 = vector.broadcast %3 : vector<1x128xf32> to vector<8x128xf32>
    %5 = arith.addf %2, %4 : vector<8x128xf32>
    %cst_5 = arith.constant 3.000000e-01 : f32
    %6 = vector.broadcast %cst_5 : f32 to vector<8x128xf32>
    %7 = arith.mulf %6, %5 : vector<8x128xf32>
    %8 = arith.maximumf %5, %7 : vector<8x128xf32>
    %c0_6 = arith.constant 0 : index
    %c0_7 = arith.constant 0 : index
    %9 = vector.load %arg4[%c0_6, %c0_7] : memref<8x128xf32, #tpu.memory_space<vmem>>, vector<8x128xf32>
    tpu.vector_store %arg4[%c0_6, %c0_7], %8 {strides = array<i32>} : memref<8x128xf32, #tpu.memory_space<vmem>>, vector<8x128xf32>,
    return
  }
  func.func @transform_0(%arg0: i32) -> (i32, i32) {
    %c0_i32 = arith.constant 0 : i32
    %c0_i32_0 = arith.constant 0 : i32
    return %arg0, %c0_i32 : i32, i32
  }
  func.func @transform_1(%arg0: i32) -> (i32, i32) {
    %c0_i32 = arith.constant 0 : i32
    %c0_i32_0 = arith.constant 0 : i32
    %c0_i32_1 = arith.constant 0 : i32
    return %c0_i32, %c0_i32_0 : i32, i32
  }
  func.func @transform_2(%arg0: i32) -> (i32, i32) {
    %c0_i32 = arith.constant 0 : i32
    %c0_i32_0 = arith.constant 0 : i32
    %c0_i32_1 = arith.constant 0 : i32
    return %c0_i32, %c0_i32_0 : i32, i32
  }
  func.func @transform_3(%arg0: i32) -> (i32, i32) {
    %c0_i32 = arith.constant 0 : i32
    %c0_i32_0 = arith.constant 0 : i32
    return %arg0, %c0_i32 : i32, i32
  }
}

module attributes {stable_mosaic.version = 11 : i64} {
  func.func @net_fc_kernel(%arg0: i32, %arg1: memref<8x128xbf16, #tpu.memory_space<vmem>>, %arg2: memref<128x128xbf16, #tpu.memory_space<vmem>>, %arg3: memref<1x128xf32, #tpu.memory_space<vmem>>, %arg4: memref<8x128xf32, #tpu.memory_space<vmem>>) attributes {dimension_semantics = [#tpu.dimension_semantics<parallel>], iteration_bounds = array<i64: 2>, scalar_prefetch = 0 : i64, scratch_operands = 0 : i64, tpu.core_type = #tpu.core_type<tc>, window_params = [{transform_indices = @transform_0, window_bounds = array<i64: 8, 128>}, {pipeline_mode = #tpu.pipeline_mode<synchronous>, transform_indices = @transform_1, window_bounds = array<i64: 128, 128>}, {pipeline_mode = #tpu.pipeline_mode<synchronous>, transform_indices = @transform_2, window_bounds = array<i64: 1, 128>}, {transform_indices = @transform_3, window_bounds = array<i64: 8, 128>}]} {
    %c0 = arith.constant 0 : index
    %c0_0 = arith.constant 0 : index
    %0 = vector.load %arg1[%c0, %c0_0] : memref<8x128xbf16, #tpu.memory_space<vmem>>, vector<8x128xbf16>
    %c0_1 = arith.constant 0 : index
    %c0_2 = arith.constant 0 : index
    %1 = vector.load %arg2[%c0_1, %c0_2] : memref<128x128xbf16, #tpu.memory_space<vmem>>, vector<128x128xbf16>
    %cst = arith.constant dense<0.000000e+00> : vector<8x128xf32>
    %2 = tpu.matmul %0, %1, %cst {dimension_numbers = #tpu.dot_dimension_numbers<[1], [0], [0], [1], [0, 0, 1, 1], [], []>} : vector<8x128xbf16>, vector<128x128xbf16>, vector<8x128xf32> -> vector<8x128xf32>
    %c0_3 = arith.constant 0 : index
    %c0_4 = arith.constant 0 : index
    %3 = vector.load %arg3[%c0_3, %c0_4] : memref<1x128xf32, #tpu.memory_space<vmem>>, vector<1x128xf32>
    %4 = vector.broadcast %3 : vector<1x128xf32> to vector<8x128xf32>
    %5 = arith.addf %2, %4 : vector<8x128xf32>
    %cst_5 = arith.constant 3.000000e-01 : f32
    %6 = vector.broadcast %cst_5 : f32 to vector<8x128xf32>
    %7 = arith.mulf %6, %5 : vector<8x128xf32>
    %8 = arith.maximumf %5, %7 : vector<8x128xf32>
    %c0_6 = arith.constant 0 : index
    %c0_7 = arith.constant 0 : index
    %9 = vector.load %arg4[%c0_6, %c0_7] : memref<8x128xf32, #tpu.memory_space<vmem>>, vector<8x128xf32>
    tpu.vector_store %arg4[%c0_6, %c0_7], %8 {strides = array<i32>} : memref<8x128xf32, #tpu.memory_space<vmem>>, vector<8x128xf32>,
    return
  }
  func.func @transform_0(%arg0: i32) -> (i32, i32) {
    %c0_i32 = arith.constant 0 : i32
    %c0_i32_0 = arith.constant 0 : i32
    return %arg0, %c0_i32 : i32, i32
  }
  func.func @transform_1(%arg0: i32) -> (i32, i32) {
    %c0_i32 = arith.constant 0 : i32
    %c0_i32_0 = arith.constant 0 : i32
    %c0_i32_1 = arith.constant 0 : i32
    return %c0_i32, %c0_i32_0 : i32, i32
  }
  func.func @transform_2(%arg0: i32) -> (i32, i32) {
    %c0_i32 = arith.constant 0 : i32
    %c0_i32_0 = arith.constant 0 : i32
    %c0_i32_1 = arith.constant 0 : i32
    return %c0_i32, %c0_i32_0 : i32, i32
  }
  func.func @transform_3(%arg0: i32) -> (i32, i32) {
    %c0_i32 = arith.constant 0 : i32
    %c0_i32_0 = arith.constant 0 : i32
    return %arg0, %c0_i32 : i32, i32
  }
}

</mosaic_0001>

<bundles_post_ra>
// kernel: tpu_custom_call.1
= control target key start
LH: loop header
LB: loop body
LE: loop exit
PB: predicated region body
PF: predicated region fallthrough
CT: control target
= control target key end

     0   :  { %8 = vsyncpa [#allocation3], 0  ;;  %s892_s0 = inlined_call_operand.hbm [shape: bf16[16,128], index: 0, kind: input, shape index: {}]   ;;  %s893_s1 = inlined_call_operand.hbm [shape: bf16[128,128], index: 1, kind: input, shape index: {}]   ;;  %s894_s2 = inlined_call_operand.vmem [shape: f32[1,128], index: 2, kind: input, shape index: {}]   ;;  %s895_s3 = inlined_call_operand.hbm [shape: f32[16,128], index: 3, kind: output, shape index: {}]  }
   0x1   :  { %10 = vsyncpa [#allocation3 + $0x1], 0 }
   0x2   :  { %11 = vsyncpa [#allocation6], 0 }
   0x3   :  { %12 = vsyncpa [#allocation4], 0 }
   0x4   :  { %14 = vsyncpa [#allocation4 + $0x1], 0  ;;  %s689_s12 = smov 0   ;;  %s691_s13 = smov 0  }
   0x5   :  { %s693_s14 = smov 0   ;;  %s695_s15 = smov 0  }
   0x6 LB: > { %s710_s16 = sadd.s32 4294967295, %s660_s15   ;;  %s411_s17 = sadd.s32 4294967294, %s660_s15   ;;  %s660_s15 = sphi %s695_s15, %s915_s15   ;;  %s656_s14 = sphi %s693_s14, %s914_s14   ;;  %s652_s13 = sphi %s691_s13, %s913_s13   ;;  %s648_s12 = sphi %s689_s12, %s912_s12  }
   0x7   : > { %p40_p0 = scmp.ne.s32.totalorder %s652_s13, %s648_s12  ;;  %p896_p1 = scmp.eq.s32.totalorder %s710_s16, 0 }
   0x8   : > { %p112_p3 = scmp.eq.s32.totalorder %s411_s17, 1  ;;  %p412_p5 = scmp.ge.s32.totalorder %s660_s15, 1 }
   0x9   : > { %p719_p4 = por %p896_p1, %p40_p0  ;;  %p119_p7 = scmp.lt.s32.totalorder %s660_s15, 3 }
   0xa   : > { %p724_p6 = por %p112_p3, %p40_p0  ;;  %s662_s21 = smov [#allocation5]  }
   0xb   : > { %s899_s18 = scalar_select %p719_p4, 1, 0 }
   0xc   : > { %s900_s19 = scalar_select %p724_p6, 1, 0 }
   0xd   : > { %p729_p8 = pnand %p412_p5, %p119_p7  ;;  %s131_s22 = sshll.u32 %s662_s21, 4  ;;  %s733_s22 = int_to_ptr.vmem [resolvable:$true] %s131_s22 }
   0xe   : > { %s745_s24 = sadd.s32 1, %s660_s15   ;;  %s27_s25 = sadd.s32 1, %s656_s14 }
   0xf   : > { %s901_s20 = scalar_select %p729_p8, 1, 0 }
  0x10   : > { %p471_p9 = pneg %p729_p8  ;;  %s24_s26 = ssub.s32 %s660_s15, %s745_s24 }
  0x11   : > { %s532_s29 = scalar_lea.hbm %s893_s1, 1024 }
  0x12   : > { %p740_p11 = pnand %p471_p9, %p896_p1  ;;  %p533_p12 = scmp.ne.s32.totalorder %s893_s1, %s532_s29 }
  0x13   : > { %p539_p5 = scmp.lt.u32.totalorder %s532_s29, %s893_s1 }
  0x14   : > { %p534_p13 = pneg %p740_p11 }
  0x16   : > { %p535_p0 = pnand %p534_p13, %p533_p12 }
  0x18   : > { %p536_p3 = pneg %p535_p0 }
  0x1a   : > { %p541_p7 = pnand %p539_p5, %p536_p3 }
  0x1c   : > { %544 = shalt.err (!%p541_p7)
}
  0x1d   : > { %s545_s7 = scalar_lea.vmem %s733_s22, 1024  ;;  %p553_p2 = scmp.lt.s32.totalorder %s733_s22, %s733_s22 }
  0x1e   : > { %p546_p9 = scmp.ne.s32.totalorder %s733_s22, %s545_s7  ;;  %p554_p6 = scmp.lt.s32.totalorder %s545_s7, %s545_s7 }
  0x20   : > { %p548_p10 = pnand %p546_p9, %p534_p13  ;;  %p555_p4 = por %p554_p6, %p553_p2 }
  0x22   : > { %p549_p1 = pneg %p548_p10 }
  0x24   : > { %p556_p8 = pnand %p555_p4, %p549_p1 }
  0x26   : > { %559 = shalt.err (!%p556_p8)
}
  0x27   : > { %s663_s8 = smov 64   ;;  %s664_s9 = smov 4  }
  0x28   : > { %474 = dma.hbm_to_vmem [thread:$0]  (!%p740_p11), %s893_s1, 1024, %s733_s22, [#allocation6], %s663_s8, %s663_s8, %s664_s9  }
  0x29   : > { %p25_p2 = scmp.eq.s32.totalorder %s24_s26, 0  ;;  %p34_p1 = scmp.ne.s32.totalorder %s656_s14, %s652_s13 }
  0x2a   : > { %p35_p4 = scmp.eq.s32.totalorder %s660_s15, 0  ;;  %p484_p6 = scmp.lt.s32.totalorder %s660_s15, 2 }
  0x2b   : > { %s776_s17 = scalar_select %p25_p2, %s656_s14, %s27_s25  }
  0x2c   : > { %p36_p8 = por %p35_p4, %p34_p1  ;;  %p903_p10 = scmp.eq.s32.totalorder %s710_s16, 1 }
  0x2d   : > { %s148_s27 = sand.u32 1, %s656_s14   ;;  %s416_s28 = sshll.u32 %s660_s15, 6 }
  0x2e   : > { %p780_p12 = por %p903_p10, %p34_p1  ;;  %s415_s29 = sshll.u32 %s148_s27, 2 }
  0x2f   : > { %s789_s4 = scalar_lea.hbm %s892_s0, %s416_s28  ;;  %s152_s22 = scalar_lea.vmem [#allocation2], %s415_s29 }
  0x30   : > { %s159_s25 = sshll.u32 %s152_s22, 4  ;;  %p791_p11 = pnand %p484_p6, %p36_p8  ;;  %s795_s25 = int_to_ptr.vmem [resolvable:$true] %s159_s25 }
  0x31   : > { %s149_s5 = scalar_lea.sflag [#allocation3], %s148_s27  ;;  %s560_s6 = scalar_lea.hbm %s789_s4, 64 }
  0x32   : > { %p561_p13 = scmp.ne.s32.totalorder %s789_s4, %s560_s6  ;;  %p562_p0 = pneg %p791_p11 }
  0x33   : > { %s565_s9 = scalar_lea.hbm %s892_s0, 128  ;;  %p566_p7 = scmp.lt.u32.totalorder %s789_s4, %s892_s0 }
  0x34   : > { %p563_p3 = pnand %p562_p0, %p561_p13  ;;  %p567_p9 = scmp.lt.u32.totalorder %s565_s9, %s560_s6 }
  0x35   : > { %p569_p1 = scmp.lt.u32.totalorder %s560_s6, %s789_s4 }
  0x36   : > { %p564_p5 = pneg %p563_p3  ;;  %p568_p2 = por %p567_p9, %p566_p7 }
  0x38   : > { %p570_p4 = por %p569_p1, %p568_p2 }
  0x3a   : > { %p571_p6 = pnand %p570_p4, %p564_p5 }
  0x3c   : > { %574 = shalt.err (!%p571_p6)
}
  0x3d   : > { %s575_s27 = scalar_lea.vmem %s795_s25, 64  ;;  %s665_s28 = smov [#allocation2]  }
  0x3e   : > { %p576_p8 = scmp.ne.s32.totalorder %s795_s25, %s575_s27  ;;  %s580_s29 = sshll.u32 %s665_s28, 4  ;;  %s581_s29 = int_to_ptr.vmem [resolvable:$false] %s580_s29 }
  0x3f   : > { %s582_s23 = scalar_lea.vmem %s581_s29, 128  ;;  %p583_p3 = scmp.lt.s32.totalorder %s795_s25, %s581_s29 }
  0x40   : > { %p578_p10 = pnand %p576_p8, %p562_p0  ;;  %p584_p7 = scmp.lt.s32.totalorder %s582_s23, %s575_s27 }
  0x42   : > { %p579_p13 = pneg %p578_p10  ;;  %p585_p9 = por %p584_p7, %p583_p3 }
  0x44   : > { %p586_p2 = pnand %p585_p9, %p579_p13 }
  0x46   : > { %589 = shalt.err (!%p586_p2)
}
  0x47   : > { %478 = dma.hbm_to_vmem [thread:$0]  (!%p791_p11), %s789_s4, 64, %s795_s25, %s149_s5  }
  0x48   : > { %p906_p5 = scmp.ne.s32.totalorder %s901_s20, 0 }
  0x49   : > { %s825_s30 = sand.u32 (!%p906_p5), 1, %s652_s13   ;;  %p907_p0 = scmp.ne.s32.totalorder (!%p906_p5), %s899_s18, 0 }
  0x4a   : > { %168 = sbr.rel (%p906_p5) target bundleno = 350 (0x15e), region = 32  ;;  %s418_s22 = sshll.u32 (!%p906_p5), %s825_s30, 2 }
  0x4b   : > { %s171_s6 = scalar_lea.sflag (!%p906_p5), [#allocation3], %s825_s30  ;;  %s829_s7 = scalar_lea.vmem (!%p906_p5), [#allocation2], %s418_s22 }
  0x51   : > { %635 = dma.done.wait (%p907_p0), %s171_s6, 64  }
  0x52   : > { %637 = vsyncadd (%p907_p0), %s171_s6, 4294967232  ;;  %p908_p11 = scmp.eq.s32.totalorder %s710_s16, 0 }
  0x54   : > { %639 = dma.done.wait (%p908_p11), [#allocation6], 1024   ;;  %p909_p1 = pmov %p908_p11 }
  0x55   : > { %v666_v0 = vmov 0.0   ;;  %vm667_vm0 = vmmov 0   ;;  %v524_v1 = vld [vmem:[#allocation5] sm:$0xff]   ;;  %v525_v2 = vld [vmem:[#allocation5 + $0x8] sm:$0xff]   ;;  %v526_v3 = vld [vmem:[#allocation5 + $0x10] sm:$0xff]   ;;  %s420_s18 = sshll.u32 %s825_s30, 3 }
  0x56   : > { %641 = vsyncadd (%p909_p1), [#allocation6], 4294966272  ;;  %443 = vmatprep.subr.bf16.mxu0 %v666_v0  ;;  %459 = vmatprep.mubr.msk.bf16.mxu0 %vm667_vm0, %v666_v0  ;;  %v527_v4 = vld [vmem:[#allocation5 + $0x18] sm:$0xff]   ;;  %v528_v5 = vld [vmem:[#allocation5 + $0x20] sm:$0xff]   ;;  %s431_s25 = sshll.u32 %s710_s16, 7  ;;  %s200_s26 = scalar_lea.vmem [#allocation7], %s420_s18 }
  0x57   : > { %444 = vmatpush3.bf16.msra.mxu0 %v524_v1  ;;  %v529_v6 = vld [vmem:[#allocation5 + $0x28] sm:$0xff]   ;;  %v530_v7 = vld [vmem:[#allocation5 + $0x30] sm:$0xff]   ;;  %v531_v8 = vld [vmem:[#allocation5 + $0x38] sm:$0xff]   ;;  %s331_s5 = sshll.u32 %s200_s26, 4  ;;  %s848_s10 = scalar_lea.hbm %s895_s3, %s431_s25  ;;  %s850_s5 = int_to_ptr.vmem [resolvable:$true] %s331_s5 }
  0x58   : > { %445 = vmatprep.subr.bf16.mxu0 %v666_v0  ;;  %v202_v9 = vld [vmem:[%s829_s7] sm:$0xf]  ;;  %s318_s11 = scalar_lea.sflag [#allocation4], %s825_s30  ;;  %s590_s27 = scalar_lea.vmem %s850_s5, 128 }
  0x59   : > { %v421_v10 = vld [vmem:[%s894_s2] ss:$0 sm:$0xff]  ;;  %p591_p4 = scmp.ne.s32.totalorder %s850_s5, %s590_s27  ;;  %s668_s16 = smov [#allocation7]  }
  0x5a   : > { %s594_s28 = sshll.u32 %s668_s16, 4  ;;  %s595_s28 = int_to_ptr.vmem [resolvable:$false] %s594_s28 }
  0x5b   : > { %446 = vmatpush3.bf16.msra.mxu0 %v525_v2  ;;  %p592_p6 = pnand %p591_p4, %p780_p12  ;;  %s596_s29 = scalar_lea.vmem %s595_s28, 256 }
  0x5c   : > { %447 = vmatprep.subr.bf16.mxu0 %v666_v0  ;;  %p597_p10 = scmp.lt.s32.totalorder %s850_s5, %s595_s28  ;;  %p598_p13 = scmp.lt.s32.totalorder %s596_s29, %s590_s27 }
  0x5d   : > { %p593_p8 = pneg %p592_p6 }
  0x5e   : > { %p599_p3 = por %p598_p13, %p597_p10 }
  0x5f   : > { %448 = vmatpush3.bf16.msra.mxu0 %v526_v3 }
  0x60   : > { %449 = vmatprep.subr.bf16.mxu0 %v666_v0  ;;  %p600_p7 = pnand %p599_p3, %p593_p8 }
  0x63   : > { %450 = vmatpush3.bf16.msra.mxu0 %v527_v4 }
  0x64   : > { %451 = vmatprep.subr.bf16.mxu0 %v666_v0 }
  0x67   : > { %452 = vmatpush3.bf16.msra.mxu0 %v528_v5 }
  0x68   : > { %453 = vmatprep.subr.bf16.mxu0 %v666_v0 }
  0x6b   : > { %454 = vmatpush3.bf16.msra.mxu0 %v529_v6 }
  0x6c   : > { %455 = vmatprep.subr.bf16.mxu0 %v666_v0 }
  0x6f   : > { %456 = vmatpush3.bf16.msra.mxu0 %v530_v7 }
  0x70   : > { %457 = vmatprep.subr.bf16.mxu0 %v666_v0 }
  0x73   : > { %458 = vmatpush3.bf16.msra.mxu0 %v531_v8 }
  0x76   : > { %460 = vmatmul.mubr.bf16.vlgmr.msra.gmra.mrb[0].mxu0 %v202_v9 }
 0x149   : > { %v308_v11 = vpop.f32.mrb[0].mxu0 }
 0x14a   : > { %v309_v12 = vadd.f32 %v421_v10, %v308_v11  ;;  %v461_v13 = vpop.f32.mrb[1].mxu0 }
 0x14b   : > { %v311_v14 = vpop.f32.mrb[2].mxu0 }
 0x14c   : > { %v314_v15 = vmul.f32 0.3, %v309_v12  ;;  %v462_v16 = vpop.f32.mrb[3].mxu0 }
 0x14e   : > { %v315_v17 = vmax.f32 %v309_v12, %v314_v15 }
 0x150   : > { %316 = vst [vmem:[%s200_s26] sm:$0xff] %v315_v17 }
 0x151   : > { %603 = shalt.err (!%p600_p7)
}
 0x152   : > { %s604_s23 = scalar_lea.hbm %s848_s10, 128  ;;  %s608_s6 = scalar_lea.hbm %s895_s3, 256 }
 0x153   : > { %p605_p9 = scmp.ne.s32.totalorder %s848_s10, %s604_s23  ;;  %p609_p0 = scmp.lt.u32.totalorder %s848_s10, %s895_s3 }
 0x154   : > { %p610_p11 = scmp.lt.u32.totalorder %s608_s6, %s604_s23  ;;  %p612_p4 = scmp.lt.u32.totalorder %s604_s23, %s848_s10 }
 0x155   : > { %p606_p2 = pnand %p605_p9, %p780_p12 }
 0x156   : > { %p611_p1 = por %p610_p11, %p609_p0 }
 0x157   : > { %p607_p5 = pneg %p606_p2 }
 0x158   : > { %p613_p6 = por %p612_p4, %p611_p1 }
 0x15a   : > { %p614_p8 = pnand %p613_p6, %p607_p5 }
 0x15c   : > { %617 = shalt.err (!%p614_p8)
}
 0x15d   : > { %469 = dma.vmem_to_hbm [thread:$0]  (%p780_p12), %s850_s5, 128, %s848_s10, %s318_s11  }
 0x15e PF: > { %s343_s20 = sand.u32 1, %s648_s12   ;;  %p910_p10 = scmp.ne.s32.totalorder %s900_s19, 0 }
 0x15f   : > { %p911_p13 = scmp.ge.s32.totalorder %s660_s15, 2  ;;  %s344_s4 = scalar_lea.sflag [#allocation4], %s343_s20 }
 0x161   : > { %p480_p3 = pnand %p911_p13, %p910_p10 }
 0x163   : > { %643 = dma.done.wait (!%p480_p3), %s344_s4, 128  }
 0x164   : > { %645 = vsyncadd (!%p480_p3), %s344_s4, 4294967168  ;;  %p17_p7 = scmp.ge.s32.totalorder %s745_s24, 4   ;;  %s912_s12 = smov %s652_s13 }
 0x165   : > { %s913_s13 = smov %s656_s14  ;;  %s914_s14 = smov %s776_s17 }
 0x166   : > { %s915_s15 = smov %s745_s24  ;;  %19 = sbr.rel (!%p17_p7) target bundleno = 6 (0x6), region = 81 }
 0x16d   :  { %349 = vsyncpa [#allocation3], 1 }
 0x16e   :  { %351 = vsyncpa [#allocation3 + $0x1], 1 }
 0x16f   :  { %352 = vsyncpa [#allocation6], 1 }
 0x170   :  { %353 = vsyncpa [#allocation4], 1 }
 0x171   :  { %355 = vsyncpa [#allocation4 + $0x1], 1 }

// kernel: tpu_custom_call.1
= control target key start
LH: loop header
LB: loop body
LE: loop exit
PB: predicated region body
PF: predicated region fallthrough
CT: control target
= control target key end

     0   :  { %8 = vsyncpa [#allocation3], 0  ;;  %s892_s0 = inlined_call_operand.hbm [shape: bf16[16,128], index: 0, kind: input, shape index: {}]   ;;  %s893_s1 = inlined_call_operand.hbm [shape: bf16[128,128], index: 1, kind: input, shape index: {}]   ;;  %s894_s2 = inlined_call_operand.vmem [shape: f32[1,128], index: 2, kind: input, shape index: {}]   ;;  %s895_s3 = inlined_call_operand.hbm [shape: f32[16,128], index: 3, kind: output, shape index: {}]  }
   0x1   :  { %10 = vsyncpa [#allocation3 + $0x1], 0 }
   0x2   :  { %11 = vsyncpa [#allocation6], 0 }
   0x3   :  { %12 = vsyncpa [#allocation4], 0 }
   0x4   :  { %14 = vsyncpa [#allocation4 + $0x1], 0  ;;  %s689_s12 = smov 0   ;;  %s691_s13 = smov 0  }
   0x5   :  { %s693_s14 = smov 0   ;;  %s695_s15 = smov 0  }
   0x6 LB: > { %s710_s16 = sadd.s32 4294967295, %s660_s15   ;;  %s411_s17 = sadd.s32 4294967294, %s660_s15   ;;  %s660_s15 = sphi %s695_s15, %s915_s15   ;;  %s656_s14 = sphi %s693_s14, %s914_s14   ;;  %s652_s13 = sphi %s691_s13, %s913_s13   ;;  %s648_s12 = sphi %s689_s12, %s912_s12  }
   0x7   : > { %p40_p0 = scmp.ne.s32.totalorder %s652_s13, %s648_s12  ;;  %p896_p1 = scmp.eq.s32.totalorder %s710_s16, 0 }
   0x8   : > { %p112_p3 = scmp.eq.s32.totalorder %s411_s17, 1  ;;  %p412_p5 = scmp.ge.s32.totalorder %s660_s15, 1 }
   0x9   : > { %p719_p4 = por %p896_p1, %p40_p0  ;;  %p119_p7 = scmp.lt.s32.totalorder %s660_s15, 3 }
   0xa   : > { %p724_p6 = por %p112_p3, %p40_p0  ;;  %s662_s21 = smov [#allocation5]  }
   0xb   : > { %s899_s18 = scalar_select %p719_p4, 1, 0 }
   0xc   : > { %s900_s19 = scalar_select %p724_p6, 1, 0 }
   0xd   : > { %p729_p8 = pnand %p412_p5, %p119_p7  ;;  %s131_s22 = sshll.u32 %s662_s21, 4  ;;  %s733_s22 = int_to_ptr.vmem [resolvable:$true] %s131_s22 }
   0xe   : > { %s745_s24 = sadd.s32 1, %s660_s15   ;;  %s27_s25 = sadd.s32 1, %s656_s14 }
   0xf   : > { %s901_s20 = scalar_select %p729_p8, 1, 0 }
  0x10   : > { %p471_p9 = pneg %p729_p8  ;;  %s24_s26 = ssub.s32 %s660_s15, %s745_s24 }
  0x11   : > { %s532_s29 = scalar_lea.hbm %s893_s1, 1024 }
  0x12   : > { %p740_p11 = pnand %p471_p9, %p896_p1  ;;  %p533_p12 = scmp.ne.s32.totalorder %s893_s1, %s532_s29 }
  0x13   : > { %p539_p5 = scmp.lt.u32.totalorder %s532_s29, %s893_s1 }
  0x14   : > { %p534_p13 = pneg %p740_p11 }
  0x16   : > { %p535_p0 = pnand %p534_p13, %p533_p12 }
  0x18   : > { %p536_p3 = pneg %p535_p0 }
  0x1a   : > { %p541_p7 = pnand %p539_p5, %p536_p3 }
  0x1c   : > { %544 = shalt.err (!%p541_p7)
}
  0x1d   : > { %s545_s7 = scalar_lea.vmem %s733_s22, 1024  ;;  %p553_p2 = scmp.lt.s32.totalorder %s733_s22, %s733_s22 }
  0x1e   : > { %p546_p9 = scmp.ne.s32.totalorder %s733_s22, %s545_s7  ;;  %p554_p6 = scmp.lt.s32.totalorder %s545_s7, %s545_s7 }
  0x20   : > { %p548_p10 = pnand %p546_p9, %p534_p13  ;;  %p555_p4 = por %p554_p6, %p553_p2 }
  0x22   : > { %p549_p1 = pneg %p548_p10 }
  0x24   : > { %p556_p8 = pnand %p555_p4, %p549_p1 }
  0x26   : > { %559 = shalt.err (!%p556_p8)
}
  0x27   : > { %s663_s8 = smov 64   ;;  %s664_s9 = smov 4  }
  0x28   : > { %474 = dma.hbm_to_vmem [thread:$0]  (!%p740_p11), %s893_s1, 1024, %s733_s22, [#allocation6], %s663_s8, %s663_s8, %s664_s9  }
  0x29   : > { %p25_p2 = scmp.eq.s32.totalorder %s24_s26, 0  ;;  %p34_p1 = scmp.ne.s32.totalorder %s656_s14, %s652_s13 }
  0x2a   : > { %p35_p4 = scmp.eq.s32.totalorder %s660_s15, 0  ;;  %p484_p6 = scmp.lt.s32.totalorder %s660_s15, 2 }
  0x2b   : > { %s776_s17 = scalar_select %p25_p2, %s656_s14, %s27_s25  }
  0x2c   : > { %p36_p8 = por %p35_p4, %p34_p1  ;;  %p903_p10 = scmp.eq.s32.totalorder %s710_s16, 1 }
  0x2d   : > { %s148_s27 = sand.u32 1, %s656_s14   ;;  %s416_s28 = sshll.u32 %s660_s15, 6 }
  0x2e   : > { %p780_p12 = por %p903_p10, %p34_p1  ;;  %s415_s29 = sshll.u32 %s148_s27, 2 }
  0x2f   : > { %s789_s4 = scalar_lea.hbm %s892_s0, %s416_s28  ;;  %s152_s22 = scalar_lea.vmem [#allocation2], %s415_s29 }
  0x30   : > { %s159_s25 = sshll.u32 %s152_s22, 4  ;;  %p791_p11 = pnand %p484_p6, %p36_p8  ;;  %s795_s25 = int_to_ptr.vmem [resolvable:$true] %s159_s25 }
  0x31   : > { %s149_s5 = scalar_lea.sflag [#allocation3], %s148_s27  ;;  %s560_s6 = scalar_lea.hbm %s789_s4, 64 }
  0x32   : > { %p561_p13 = scmp.ne.s32.totalorder %s789_s4, %s560_s6  ;;  %p562_p0 = pneg %p791_p11 }
  0x33   : > { %s565_s9 = scalar_lea.hbm %s892_s0, 128  ;;  %p566_p7 = scmp.lt.u32.totalorder %s789_s4, %s892_s0 }
  0x34   : > { %p563_p3 = pnand %p562_p0, %p561_p13  ;;  %p567_p9 = scmp.lt.u32.totalorder %s565_s9, %s560_s6 }
  0x35   : > { %p569_p1 = scmp.lt.u32.totalorder %s560_s6, %s789_s4 }
  0x36   : > { %p564_p5 = pneg %p563_p3  ;;  %p568_p2 = por %p567_p9, %p566_p7 }
  0x38   : > { %p570_p4 = por %p569_p1, %p568_p2 }
  0x3a   : > { %p571_p6 = pnand %p570_p4, %p564_p5 }
  0x3c   : > { %574 = shalt.err (!%p571_p6)
}
  0x3d   : > { %s575_s27 = scalar_lea.vmem %s795_s25, 64  ;;  %s665_s28 = smov [#allocation2]  }
  0x3e   : > { %p576_p8 = scmp.ne.s32.totalorder %s795_s25, %s575_s27  ;;  %s580_s29 = sshll.u32 %s665_s28, 4  ;;  %s581_s29 = int_to_ptr.vmem [resolvable:$false] %s580_s29 }
  0x3f   : > { %s582_s23 = scalar_lea.vmem %s581_s29, 128  ;;  %p583_p3 = scmp.lt.s32.totalorder %s795_s25, %s581_s29 }
  0x40   : > { %p578_p10 = pnand %p576_p8, %p562_p0  ;;  %p584_p7 = scmp.lt.s32.totalorder %s582_s23, %s575_s27 }
  0x42   : > { %p579_p13 = pneg %p578_p10  ;;  %p585_p9 = por %p584_p7, %p583_p3 }
  0x44   : > { %p586_p2 = pnand %p585_p9, %p579_p13 }
  0x46   : > { %589 = shalt.err (!%p586_p2)
}
  0x47   : > { %478 = dma.hbm_to_vmem [thread:$0]  (!%p791_p11), %s789_s4, 64, %s795_s25, %s149_s5  }
  0x48   : > { %p906_p5 = scmp.ne.s32.totalorder %s901_s20, 0 }
  0x49   : > { %s825_s30 = sand.u32 (!%p906_p5), 1, %s652_s13   ;;  %p907_p0 = scmp.ne.s32.totalorder (!%p906_p5), %s899_s18, 0 }
  0x4a   : > { %168 = sbr.rel (%p906_p5) target bundleno = 350 (0x15e), region = 32  ;;  %s418_s22 = sshll.u32 (!%p906_p5), %s825_s30, 2 }
  0x4b   : > { %s171_s6 = scalar_lea.sflag (!%p906_p5), [#allocation3], %s825_s30  ;;  %s829_s7 = scalar_lea.vmem (!%p906_p5), [#allocation2], %s418_s22 }
  0x51   : > { %635 = dma.done.wait (%p907_p0), %s171_s6, 64  }
  0x52   : > { %637 = vsyncadd (%p907_p0), %s171_s6, 4294967232  ;;  %p908_p11 = scmp.eq.s32.totalorder %s710_s16, 0 }
  0x54   : > { %639 = dma.done.wait (%p908_p11), [#allocation6], 1024   ;;  %p909_p1 = pmov %p908_p11 }
  0x55   : > { %v666_v0 = vmov 0.0   ;;  %vm667_vm0 = vmmov 0   ;;  %v524_v1 = vld [vmem:[#allocation5] sm:$0xff]   ;;  %v525_v2 = vld [vmem:[#allocation5 + $0x8] sm:$0xff]   ;;  %v526_v3 = vld [vmem:[#allocation5 + $0x10] sm:$0xff]   ;;  %s420_s18 = sshll.u32 %s825_s30, 3 }
  0x56   : > { %641 = vsyncadd (%p909_p1), [#allocation6], 4294966272  ;;  %443 = vmatprep.subr.bf16.mxu0 %v666_v0  ;;  %459 = vmatprep.mubr.msk.bf16.mxu0 %vm667_vm0, %v666_v0  ;;  %v527_v4 = vld [vmem:[#allocation5 + $0x18] sm:$0xff]   ;;  %v528_v5 = vld [vmem:[#allocation5 + $0x20] sm:$0xff]   ;;  %s431_s25 = sshll.u32 %s710_s16, 7  ;;  %s200_s26 = scalar_lea.vmem [#allocation7], %s420_s18 }
  0x57   : > { %444 = vmatpush3.bf16.msra.mxu0 %v524_v1  ;;  %v529_v6 = vld [vmem:[#allocation5 + $0x28] sm:$0xff]   ;;  %v530_v7 = vld [vmem:[#allocation5 + $0x30] sm:$0xff]   ;;  %v531_v8 = vld [vmem:[#allocation5 + $0x38] sm:$0xff]   ;;  %s331_s5 = sshll.u32 %s200_s26, 4  ;;  %s848_s10 = scalar_lea.hbm %s895_s3, %s431_s25  ;;  %s850_s5 = int_to_ptr.vmem [resolvable:$true] %s331_s5 }
  0x58   : > { %445 = vmatprep.subr.bf16.mxu0 %v666_v0  ;;  %v202_v9 = vld [vmem:[%s829_s7] sm:$0xf]  ;;  %s318_s11 = scalar_lea.sflag [#allocation4], %s825_s30  ;;  %s590_s27 = scalar_lea.vmem %s850_s5, 128 }
  0x59   : > { %v421_v10 = vld [vmem:[%s894_s2] ss:$0 sm:$0xff]  ;;  %p591_p4 = scmp.ne.s32.totalorder %s850_s5, %s590_s27  ;;  %s668_s16 = smov [#allocation7]  }
  0x5a   : > { %s594_s28 = sshll.u32 %s668_s16, 4  ;;  %s595_s28 = int_to_ptr.vmem [resolvable:$false] %s594_s28 }
  0x5b   : > { %446 = vmatpush3.bf16.msra.mxu0 %v525_v2  ;;  %p592_p6 = pnand %p591_p4, %p780_p12  ;;  %s596_s29 = scalar_lea.vmem %s595_s28, 256 }
  0x5c   : > { %447 = vmatprep.subr.bf16.mxu0 %v666_v0  ;;  %p597_p10 = scmp.lt.s32.totalorder %s850_s5, %s595_s28  ;;  %p598_p13 = scmp.lt.s32.totalorder %s596_s29, %s590_s27 }
  0x5d   : > { %p593_p8 = pneg %p592_p6 }
  0x5e   : > { %p599_p3 = por %p598_p13, %p597_p10 }
  0x5f   : > { %448 = vmatpush3.bf16.msra.mxu0 %v526_v3 }
  0x60   : > { %449 = vmatprep.subr.bf16.mxu0 %v666_v0  ;;  %p600_p7 = pnand %p599_p3, %p593_p8 }
  0x63   : > { %450 = vmatpush3.bf16.msra.mxu0 %v527_v4 }
  0x64   : > { %451 = vmatprep.subr.bf16.mxu0 %v666_v0 }
  0x67   : > { %452 = vmatpush3.bf16.msra.mxu0 %v528_v5 }
  0x68   : > { %453 = vmatprep.subr.bf16.mxu0 %v666_v0 }
  0x6b   : > { %454 = vmatpush3.bf16.msra.mxu0 %v529_v6 }
  0x6c   : > { %455 = vmatprep.subr.bf16.mxu0 %v666_v0 }
  0x6f   : > { %456 = vmatpush3.bf16.msra.mxu0 %v530_v7 }
  0x70   : > { %457 = vmatprep.subr.bf16.mxu0 %v666_v0 }
  0x73   : > { %458 = vmatpush3.bf16.msra.mxu0 %v531_v8 }
  0x76   : > { %460 = vmatmul.mubr.bf16.vlgmr.msra.gmra.mrb[0].mxu0 %v202_v9 }
 0x149   : > { %v308_v11 = vpop.f32.mrb[0].mxu0 }
 0x14a   : > { %v309_v12 = vadd.f32 %v421_v10, %v308_v11  ;;  %v461_v13 = vpop.f32.mrb[1].mxu0 }
 0x14b   : > { %v311_v14 = vpop.f32.mrb[2].mxu0 }
 0x14c   : > { %v314_v15 = vmul.f32 0.3, %v309_v12  ;;  %v462_v16 = vpop.f32.mrb[3].mxu0 }
 0x14e   : > { %v315_v17 = vmax.f32 %v309_v12, %v314_v15 }
 0x150   : > { %316 = vst [vmem:[%s200_s26] sm:$0xff] %v315_v17 }
 0x151   : > { %603 = shalt.err (!%p600_p7)
}
 0x152   : > { %s604_s23 = scalar_lea.hbm %s848_s10, 128  ;;  %s608_s6 = scalar_lea.hbm %s895_s3, 256 }
 0x153   : > { %p605_p9 = scmp.ne.s32.totalorder %s848_s10, %s604_s23  ;;  %p609_p0 = scmp.lt.u32.totalorder %s848_s10, %s895_s3 }
 0x154   : > { %p610_p11 = scmp.lt.u32.totalorder %s608_s6, %s604_s23  ;;  %p612_p4 = scmp.lt.u32.totalorder %s604_s23, %s848_s10 }
 0x155   : > { %p606_p2 = pnand %p605_p9, %p780_p12 }
 0x156   : > { %p611_p1 = por %p610_p11, %p609_p0 }
 0x157   : > { %p607_p5 = pneg %p606_p2 }
 0x158   : > { %p613_p6 = por %p612_p4, %p611_p1 }
 0x15a   : > { %p614_p8 = pnand %p613_p6, %p607_p5 }
 0x15c   : > { %617 = shalt.err (!%p614_p8)
}
 0x15d   : > { %469 = dma.vmem_to_hbm [thread:$0]  (%p780_p12), %s850_s5, 128, %s848_s10, %s318_s11  }
 0x15e PF: > { %s343_s20 = sand.u32 1, %s648_s12   ;;  %p910_p10 = scmp.ne.s32.totalorder %s900_s19, 0 }
 0x15f   : > { %p911_p13 = scmp.ge.s32.totalorder %s660_s15, 2  ;;  %s344_s4 = scalar_lea.sflag [#allocation4], %s343_s20 }
 0x161   : > { %p480_p3 = pnand %p911_p13, %p910_p10 }
 0x163   : > { %643 = dma.done.wait (!%p480_p3), %s344_s4, 128  }
 0x164   : > { %645 = vsyncadd (!%p480_p3), %s344_s4, 4294967168  ;;  %p17_p7 = scmp.ge.s32.totalorder %s745_s24, 4   ;;  %s912_s12 = smov %s652_s13 }
 0x165   : > { %s913_s13 = smov %s656_s14  ;;  %s914_s14 = smov %s776_s17 }
 0x166   : > { %s915_s15 = smov %s745_s24  ;;  %19 = sbr.rel (!%p17_p7) target bundleno = 6 (0x6), region = 81 }
 0x16d   :  { %349 = vsyncpa [#allocation3], 1 }
 0x16e   :  { %351 = vsyncpa [#allocation3 + $0x1], 1 }
 0x16f   :  { %352 = vsyncpa [#allocation6], 1 }
 0x170   :  { %353 = vsyncpa [#allocation4], 1 }
 0x171   :  { %355 = vsyncpa [#allocation4 + $0x1], 1 }

</bundles_post_ra>
